<compile_context>
chip_gen: v7x
topology: tpu7x:2x2x1
jax: 0.10.0
libtpu: 0.0.40
codegen_flags: <defaults>
</compile_context>

<pallas_src>
import numpy as np
import jax
import jax.numpy as jnp
from jax.experimental import pallas as pl
from jax.experimental.pallas import tpu as pltpu

_MEAN_EXPECTED = np.array([0.48145466, 0.4578275, 0.40821073], np.float64)
_STD_EXPECTED = np.array([0.26862954, 0.26130258, 0.27577711], np.float64)
_MEAN = (2.0 * _MEAN_EXPECTED - 1.0).astype(np.float32)   # transforms.Normalize mean
_STD = (2.0 * _STD_EXPECTED).astype(np.float32)           # transforms.Normalize std


# ----------------------------------------------------------------------------
# Single fused kernel: pool -> folded(normalize + projection) -> folded MLP head -> loss
# ----------------------------------------------------------------------------
def _fused_loss_kernel(t_ref, r_ref, proj_ref, ebias_ref, wvec_ref, bsc_ref, o_ref):
    # t_ref, r_ref : (3, B, H*W) f32  target / recon images (lane-dense H*W)
    # proj_ref     : (3, 768)    f32  stand-in CLIP projection with 1/std folded in
    # ebias_ref    : (1, 768)    f32  -(mean/std) @ proj   (normalize offset, folded)
    # wvec_ref     : (1, 768)    f32  W1@W2@W3@W4@W5 of the head, stored as a row
    # bsc_ref      : (1, 1)      f32  folded head bias (cancels in score_diff; kept
    #                                  so each score matches the PyTorch module)
    # o_ref        : (1, 1)      f32  loss
    hw = t_ref.shape[-1]
    batch = t_ref.shape[1]
    inv_hw = 1.0 / float(hw)

    def embed(img_ref):
        # e = mean_hw((x - m)/s) @ proj  ==  mean_hw(x) @ proj_eff + ebias
        e = ebias_ref[...]                                                   # (1, 768)
        for c in range(3):                                                   # unrolled
            pooled_c = jnp.sum(img_ref[c], axis=-1, keepdims=True) * inv_hw  # (B, 1)
            e = e + pooled_c * proj_ref[c:c + 1, :]                          # (B, 768)
        return e

    def score(e):
        # Folded 768->1024->128->64->16->1 head (Dropouts identity, no nonlinearities):
        # broadcast multiply + lane reduce instead of an N=1 lane-masked matmul.
        return jnp.sum(e * wvec_ref[...], axis=-1, keepdims=True) + bsc_ref[...]  # (B, 1)

    score_target = score(embed(t_ref))   # .detach() is a no-op for the forward value
    score_recon = score(embed(r_ref))
    score_diff = score_target - score_recon
    out = jnp.maximum(1.0 - score_diff, 0.0) * 0.5            # relu(1 - diff) * 0.5
    o_ref[...] = jnp.sum(out, axis=0, keepdims=True) * (1.0 / float(batch))


# ----------------------------------------------------------------------------
# One-time offline folds (forward-exact: the head has no activation functions)
# ----------------------------------------------------------------------------
def fold_head(params):
    w_eff, b_eff = None, None
    for w, b in params:                      # w: (in, out), b: (1, out)
        if w_eff is None:
            w_eff, b_eff = w, b
        else:
            w_eff = w_eff @ w
            b_eff = b_eff @ w + b
    return jnp.transpose(w_eff), b_eff       # (1, 768), (1, 1)


def fold_encoder(clip_proj):
    inv_std = jnp.asarray(1.0 / _STD, jnp.float32)                       # (3,)
    proj_eff = clip_proj * inv_std[:, None]                              # (3, 768)
    ebias = -jnp.asarray(_MEAN / _STD, jnp.float32).reshape(1, 3) @ clip_proj  # (1, 768)
    return proj_eff, ebias


def fold_params(params, clip_proj):
    proj_eff, ebias = fold_encoder(clip_proj)
    w_eff, b_eff = fold_head(params)
    return proj_eff, ebias, w_eff, b_eff


# ----------------------------------------------------------------------------
# Full forward (single pallas_call)
# ----------------------------------------------------------------------------
def aesthetic_score_loss(target_img, recon_img, folded):
    proj_eff, ebias, w_eff, b_eff = folded
    B, C, H, W = target_img.shape
    assert C == 3

    def prep(img):
        # Lane-dense layout: H*W (multiple of 128 for 16x16 and 224x224) on the lane
        # axis; channel slabs are contiguous leading-dim slices.
        return jnp.transpose(img.reshape(B, C, H * W), (1, 0, 2)).astype(jnp.float32)

    vmem = pl.BlockSpec(memory_space=pltpu.MemorySpace.VMEM)
    out = pl.pallas_call(
        _fused_loss_kernel,
        out_shape=jax.ShapeDtypeStruct((1, 1), jnp.float32),
        in_specs=[vmem] * 6,
        out_specs=vmem,
    )(prep(target_img), prep(recon_img), proj_eff, ebias, w_eff, b_eff)
    return out.reshape(1)   # matches torch.sum(out, dim=0) / B -> shape (1,)


# ----------------------------------------------------------------------------
# Parameter setup (deterministic, torch.nn.Linear-style uniform init)
# ----------------------------------------------------------------------------
def init_params(key):
    dims = [(768, 1024), (1024, 128), (128, 64), (64, 16), (16, 1)]
    params = []
    for fan_in, fan_out in dims:
        key, kw, kb = jax.random.split(key, 3)
        bound = 1.0 / np.sqrt(fan_in)
        w = jax.random.uniform(kw, (fan_in, fan_out), jnp.float32, -bound, bound)
        b = jax.random.uniform(kb, (1, fan_out), jnp.float32, -bound, bound)
        params.append((w, b))
    return params


# ----------------------------------------------------------------------------
# Pure-JAX reference (unfolded path) for validation
# ----------------------------------------------------------------------------
def _reference_loss(target_img, recon_img, params, clip_proj):
    mean = jnp.asarray(_MEAN, jnp.float32).reshape(1, 3, 1, 1)
    std = jnp.asarray(_STD, jnp.float32).reshape(1, 3, 1, 1)

    def calc(img):
        scaled = (img - mean) / std
        pooled = jnp.mean(scaled, axis=(2, 3))        # stand-in for interpolate + CLIP
        h = pooled @ clip_proj
        for w, b in params:                           # Dropouts are identity
            h = h @ w + b
        return h

    diff = calc(target_img) - calc(recon_img)
    out = jax.nn.relu(1.0 - diff) * 0.5
    return jnp.sum(out, axis=0) / diff.shape[0]


if __name__ == "__main__":
    key = jax.random.PRNGKey(0)
    k_img1, k_img2, k_proj, k_params = jax.random.split(key, 4)

    B, C, H, W = 2, 3, 16, 16
    target_img = jax.random.uniform(k_img1, (B, C, H, W), jnp.float32, minval=-1.0, maxval=1.0)
    recon_img = jax.random.uniform(k_img2, (B, C, H, W), jnp.float32, minval=-1.0, maxval=1.0)

    params = init_params(k_params)
    clip_proj = jax.random.normal(k_proj, (C, 768), jnp.float32) * 0.1  # stand-in encoder proj

    folded = fold_params(params, clip_proj)            # one-time offline fold
    loss = aesthetic_score_loss(target_img, recon_img, folded)
    jax.block_until_ready(loss)
    assert loss.shape == (1,) and loss.dtype == jnp.float32

    ref = _reference_loss(target_img, recon_img, params, clip_proj)
    np.testing.assert_allclose(np.asarray(loss), np.asarray(ref), rtol=1e-3, atol=1e-3)
    print("KERNEL_OK")
</pallas_src>

<mosaic_0001>
module attributes {stable_mosaic.version = 11 : i64} {
  func.func @_fused_loss_kernel(%arg0: memref<3x2x256xf32, #tpu.memory_space<vmem>>, %arg1: memref<3x2x256xf32, #tpu.memory_space<vmem>>, %arg2: memref<3x768xf32, #tpu.memory_space<vmem>>, %arg3: memref<1x768xf32, #tpu.memory_space<vmem>>, %arg4: memref<1x768xf32, #tpu.memory_space<vmem>>, %arg5: memref<1x1xf32, #tpu.memory_space<vmem>>, %arg6: memref<1x1xf32, #tpu.memory_space<vmem>>) attributes {dimension_semantics = [], scalar_prefetch = 0 : i64, scratch_operands = 0 : i64, tpu.core_type = #tpu.core_type<tc>} {
    %c0 = arith.constant 0 : index
    %c0_0 = arith.constant 0 : index
    %0 = vector.load %arg3[%c0, %c0_0] : memref<1x768xf32, #tpu.memory_space<vmem>>, vector<1x768xf32>
    %c0_1 = arith.constant 0 : index
    %c0_2 = arith.constant 0 : index
    %c0_3 = arith.constant 0 : index
    %1 = vector.load %arg0[%c0_1, %c0_2, %c0_3] : memref<3x2x256xf32, #tpu.memory_space<vmem>>, vector<1x2x256xf32>
    %2 = vector.shape_cast %1 : vector<1x2x256xf32> to vector<2x256xf32>
    %cst = arith.constant dense<0.000000e+00> : vector<2xf32>
    %3 = vector.multi_reduction <add>, %2, %cst [1] : vector<2x256xf32> to vector<2xf32>
    %4 = vector.shape_cast %3 : vector<2xf32> to vector<2x1xf32>
    %cst_4 = arith.constant 3.906250e-03 : f32
    %5 = vector.broadcast %cst_4 : f32 to vector<2x1xf32>
    %6 = arith.mulf %4, %5 : vector<2x1xf32>
    %c0_5 = arith.constant 0 : index
    %c0_6 = arith.constant 0 : index
    %7 = vector.load %arg2[%c0_5, %c0_6] : memref<3x768xf32, #tpu.memory_space<vmem>>, vector<1x768xf32>
    %8 = vector.broadcast %6 : vector<2x1xf32> to vector<2x768xf32>
    %9 = vector.broadcast %7 : vector<1x768xf32> to vector<2x768xf32>
    %10 = arith.mulf %8, %9 : vector<2x768xf32>
    %11 = vector.broadcast %0 : vector<1x768xf32> to vector<2x768xf32>
    %12 = arith.addf %11, %10 : vector<2x768xf32>
    %c1 = arith.constant 1 : index
    %c0_7 = arith.constant 0 : index
    %c0_8 = arith.constant 0 : index
    %13 = vector.load %arg0[%c1, %c0_7, %c0_8] : memref<3x2x256xf32, #tpu.memory_space<vmem>>, vector<1x2x256xf32>
    %14 = vector.shape_cast %13 : vector<1x2x256xf32> to vector<2x256xf32>
    %cst_9 = arith.constant dense<0.000000e+00> : vector<2xf32>
    %15 = vector.multi_reduction <add>, %14, %cst_9 [1] : vector<2x256xf32> to vector<2xf32>
    %16 = vector.shape_cast %15 : vector<2xf32> to vector<2x1xf32>
    %cst_10 = arith.constant 3.906250e-03 : f32
    %17 = vector.broadcast %cst_10 : f32 to vector<2x1xf32>
    %18 = arith.mulf %16, %17 : vector<2x1xf32>
    %c1_11 = arith.constant 1 : index
    %c0_12 = arith.constant 0 : index
    %19 = vector.load %arg2[%c1_11, %c0_12] : memref<3x768xf32, #tpu.memory_space<vmem>>, vector<1x768xf32>
    %20 = vector.broadcast %18 : vector<2x1xf32> to vector<2x768xf32>
    %21 = vector.broadcast %19 : vector<1x768xf32> to vector<2x768xf32>
    %22 = arith.mulf %20, %21 : vector<2x768xf32>
    %23 = arith.addf %12, %22 : vector<2x768xf32>
    %c2 = arith.constant 2 : index
    %c0_13 = arith.constant 0 : index
    %c0_14 = arith.constant 0 : index
    %24 = vector.load %arg0[%c2, %c0_13, %c0_14] : memref<3x2x256xf32, #tpu.memory_space<vmem>>, vector<1x2x256xf32>
    %25 = vector.shape_cast %24 : vector<1x2x256xf32> to vector<2x256xf32>
    %cst_15 = arith.constant dense<0.000000e+00> : vector<2xf32>
    %26 = vector.multi_reduction <add>, %25, %cst_15 [1] : vector<2x256xf32> to vector<2xf32>
    %27 = vector.shape_cast %26 : vector<2xf32> to vector<2x1xf32>
    %cst_16 = arith.constant 3.906250e-03 : f32
    %28 = vector.broadcast %cst_16 : f32 to vector<2x1xf32>
    %29 = arith.mulf %27, %28 : vector<2x1xf32>
    %c2_17 = arith.constant 2 : index
    %c0_18 = arith.constant 0 : index
    %30 = vector.load %arg2[%c2_17, %c0_18] : memref<3x768xf32, #tpu.memory_space<vmem>>, vector<1x768xf32>
    %31 = vector.broadcast %29 : vector<2x1xf32> to vector<2x768xf32>
    %32 = vector.broadcast %30 : vector<1x768xf32> to vector<2x768xf32>
    %33 = arith.mulf %31, %32 : vector<2x768xf32>
    %34 = arith.addf %23, %33 : vector<2x768xf32>
    %c0_19 = arith.constant 0 : index
    %c0_20 = arith.constant 0 : index
    %35 = vector.load %arg4[%c0_19, %c0_20] : memref<1x768xf32, #tpu.memory_space<vmem>>, vector<1x768xf32>
    %36 = vector.broadcast %35 : vector<1x768xf32> to vector<2x768xf32>
    %37 = arith.mulf %34, %36 : vector<2x768xf32>
    %cst_21 = arith.constant dense<0.000000e+00> : vector<2xf32>
    %38 = vector.multi_reduction <add>, %37, %cst_21 [1] : vector<2x768xf32> to vector<2xf32>
    %39 = vector.shape_cast %38 : vector<2xf32> to vector<2x1xf32>
    %c0_22 = arith.constant 0 : index
    %c0_23 = arith.constant 0 : index
    %40 = vector.load %arg5[%c0_22, %c0_23] : memref<1x1xf32, #tpu.memory_space<vmem>>, vector<1x1xf32>
    %41 = vector.broadcast %40 : vector<1x1xf32> to vector<2x1xf32>
    %42 = arith.addf %39, %41 : vector<2x1xf32>
    %c0_24 = arith.constant 0 : index
    %c0_25 = arith.constant 0 : index
    %43 = vector.load %arg3[%c0_24, %c0_25] : memref<1x768xf32, #tpu.memory_space<vmem>>, vector<1x768xf32>
    %c0_26 = arith.constant 0 : index
    %c0_27 = arith.constant 0 : index
    %c0_28 = arith.constant 0 : index
    %44 = vector.load %arg1[%c0_26, %c0_27, %c0_28] : memref<3x2x256xf32, #tpu.memory_space<vmem>>, vector<1x2x256xf32>
    %45 = vector.shape_cast %44 : vector<1x2x256xf32> to vector<2x256xf32>
    %cst_29 = arith.constant dense<0.000000e+00> : vector<2xf32>
    %46 = vector.multi_reduction <add>, %45, %cst_29 [1] : vector<2x256xf32> to vector<2xf32>
    %47 = vector.shape_cast %46 : vector<2xf32> to vector<2x1xf32>
    %cst_30 = arith.constant 3.906250e-03 : f32
    %48 = vector.broadcast %cst_30 : f32 to vector<2x1xf32>
    %49 = arith.mulf %47, %48 : vector<2x1xf32>
    %c0_31 = arith.constant 0 : index
    %c0_32 = arith.constant 0 : index
    %50 = vector.load %arg2[%c0_31, %c0_32] : memref<3x768xf32, #tpu.memory_space<vmem>>, vector<1x768xf32>
    %51 = vector.broadcast %49 : vector<2x1xf32> to vector<2x768xf32>
    %52 = vector.broadcast %50 : vector<1x768xf32> to vector<2x768xf32>
    %53 = arith.mulf %51, %52 : vector<2x768xf32>
    %54 = vector.broadcast %43 : vector<1x768xf32> to vector<2x768xf32>
    %55 = arith.addf %54, %53 : vector<2x768xf32>
    %c1_33 = arith.constant 1 : index
    %c0_34 = arith.constant 0 : index
    %c0_35 = arith.constant 0 : index
    %56 = vector.load %arg1[%c1_33, %c0_34, %c0_35] : memref<3x2x256xf32, #tpu.memory_space<vmem>>, vector<1x2x256xf32>
    %57 = vector.shape_cast %56 : vector<1x2x256xf32> to vector<2x256xf32>
    %cst_36 = arith.constant dense<0.000000e+00> : vector<2xf32>
    %58 = vector.multi_reduction <add>, %57, %cst_36 [1] : vector<2x256xf32> to vector<2xf32>
    %59 = vector.shape_cast %58 : vector<2xf32> to vector<2x1xf32>
    %cst_37 = arith.constant 3.906250e-03 : f32
    %60 = vector.broadcast %cst_37 : f32 to vector<2x1xf32>
    %61 = arith.mulf %59, %60 : vector<2x1xf32>
    %c1_38 = arith.constant 1 : index
    %c0_39 = arith.constant 0 : index
    %62 = vector.load %arg2[%c1_38, %c0_39] : memref<3x768xf32, #tpu.memory_space<vmem>>, vector<1x768xf32>
    %63 = vector.broadcast %61 : vector<2x1xf32> to vector<2x768xf32>
    %64 = vector.broadcast %62 : vector<1x768xf32> to vector<2x768xf32>
    %65 = arith.mulf %63, %64 : vector<2x768xf32>
    %66 = arith.addf %55, %65 : vector<2x768xf32>
    %c2_40 = arith.constant 2 : index
    %c0_41 = arith.constant 0 : index
    %c0_42 = arith.constant 0 : index
    %67 = vector.load %arg1[%c2_40, %c0_41, %c0_42] : memref<3x2x256xf32, #tpu.memory_space<vmem>>, vector<1x2x256xf32>
    %68 = vector.shape_cast %67 : vector<1x2x256xf32> to vector<2x256xf32>
    %cst_43 = arith.constant dense<0.000000e+00> : vector<2xf32>
    %69 = vector.multi_reduction <add>, %68, %cst_43 [1] : vector<2x256xf32> to vector<2xf32>
    %70 = vector.shape_cast %69 : vector<2xf32> to vector<2x1xf32>
    %cst_44 = arith.constant 3.906250e-03 : f32
    %71 = vector.broadcast %cst_44 : f32 to vector<2x1xf32>
    %72 = arith.mulf %70, %71 : vector<2x1xf32>
    %c2_45 = arith.constant 2 : index
    %c0_46 = arith.constant 0 : index
    %73 = vector.load %arg2[%c2_45, %c0_46] : memref<3x768xf32, #tpu.memory_space<vmem>>, vector<1x768xf32>
    %74 = vector.broadcast %72 : vector<2x1xf32> to vector<2x768xf32>
    %75 = vector.broadcast %73 : vector<1x768xf32> to vector<2x768xf32>
    %76 = arith.mulf %74, %75 : vector<2x768xf32>
    %77 = arith.addf %66, %76 : vector<2x768xf32>
    %c0_47 = arith.constant 0 : index
    %c0_48 = arith.constant 0 : index
    %78 = vector.load %arg4[%c0_47, %c0_48] : memref<1x768xf32, #tpu.memory_space<vmem>>, vector<1x768xf32>
    %79 = vector.broadcast %78 : vector<1x768xf32> to vector<2x768xf32>
    %80 = arith.mulf %77, %79 : vector<2x768xf32>
    %cst_49 = arith.constant dense<0.000000e+00> : vector<2xf32>
    %81 = vector.multi_reduction <add>, %80, %cst_49 [1] : vector<2x768xf32> to vector<2xf32>
    %82 = vector.shape_cast %81 : vector<2xf32> to vector<2x1xf32>
    %c0_50 = arith.constant 0 : index
    %c0_51 = arith.constant 0 : index
    %83 = vector.load %arg5[%c0_50, %c0_51] : memref<1x1xf32, #tpu.memory_space<vmem>>, vector<1x1xf32>
    %84 = vector.broadcast %83 : vector<1x1xf32> to vector<2x1xf32>
    %85 = arith.addf %82, %84 : vector<2x1xf32>
    %86 = arith.subf %42, %85 : vector<2x1xf32>
    %cst_52 = arith.constant 1.000000e+00 : f32
    %87 = vector.broadcast %cst_52 : f32 to vector<2x1xf32>
    %88 = arith.subf %87, %86 : vector<2x1xf32>
    %cst_53 = arith.constant 0.000000e+00 : f32
    %89 = vector.broadcast %cst_53 : f32 to vector<2x1xf32>
    %90 = arith.maximumf %88, %89 : vector<2x1xf32>
    %cst_54 = arith.constant 5.000000e-01 : f32
    %91 = vector.broadcast %cst_54 : f32 to vector<2x1xf32>
    %92 = arith.mulf %90, %91 : vector<2x1xf32>
    %cst_55 = arith.constant dense<0.000000e+00> : vector<1xf32>
    %93 = vector.multi_reduction <add>, %92, %cst_55 [0] : vector<2x1xf32> to vector<1xf32>
    %94 = vector.shape_cast %93 : vector<1xf32> to vector<1x1xf32>
    %cst_56 = arith.constant 5.000000e-01 : f32
    %95 = vector.broadcast %cst_56 : f32 to vector<1x1xf32>
    %96 = arith.mulf %94, %95 : vector<1x1xf32>
    %c0_57 = arith.constant 0 : index
    %c0_58 = arith.constant 0 : index
    %97 = vector.load %arg6[%c0_57, %c0_58] : memref<1x1xf32, #tpu.memory_space<vmem>>, vector<1x1xf32>
    tpu.vector_store %arg6[%c0_57, %c0_58], %96 {strides = array<i32>} : memref<1x1xf32, #tpu.memory_space<vmem>>, vector<1x1xf32>,
    return
  }
}

</mosaic_0001>

<bundles_post_ra>
// kernel: tpu_custom_call.1
= control target key start
LH: loop header
LB: loop body
LE: loop exit
PB: predicated region body
PF: predicated region fallthrough
CT: control target
= control target key end

     0   :  { %s825_s0 = inlined_call_operand.hbm [shape: f32[3,2,256], index: 0, kind: input, shape index: {}]   ;;  %s826_s1 = inlined_call_operand.hbm [shape: f32[3,2,256], index: 1, kind: input, shape index: {}]   ;;  %s827_s2 = inlined_call_operand.hbm [shape: f32[3,768], index: 2, kind: input, shape index: {}]   ;;  %s828_s3 = inlined_call_operand.vmem [shape: f32[1,768], index: 3, kind: input, shape index: {}]   ;;  %s829_s4 = inlined_call_operand.vmem [shape: f32[1,768], index: 4, kind: input, shape index: {}]   ;;  %s830_s5 = inlined_call_operand.<no memory space> [shape: f32[1,1], index: 5, kind: input, shape index: {}]   ;;  %s831_s6 = inlined_call_operand.hbm [shape: f32[1,1], index: 6, kind: output, shape index: {}]  }
   0x1   :  { %v11_v0 = vstv %s830_s5 }
   0x2   :  { %12 = vst [vmem:[#allocation2] sm:$0x1] %v11_v0 }
   0x3   :  { %13 = vsyncpa [#allocation4], 0 }
   0x4   :  { %14 = vsyncpa [#allocation7], 0 }
   0x5   :  { %15 = vsyncpa [#allocation5], 0  ;;  %s597_s23 = smov [#allocation6]   ;;  %s598_s25 = smov [#allocation3]  }
   0x6   :  { %s33_s24 = sshll.u32 %s597_s23, 4  ;;  %s21_s26 = sshll.u32 %s598_s25, 4  ;;  %s34_s24 = int_to_ptr.vmem [resolvable:$true] %s33_s24  ;;  %s641_s26 = int_to_ptr.vmem [resolvable:$true] %s21_s26 }
   0x7   :  { %s503_s29 = scalar_lea.hbm %s826_s1, 192 }
   0x8   :  { %p504_p0 = scmp.ne.s32.totalorder %s826_s1, %s503_s29  ;;  %p507_p1 = scmp.lt.u32.totalorder %s503_s29, %s826_s1 }
   0xa   :  { %p509_p2 = pnand %p507_p1, %p504_p0 }
   0xc   :  { %512 = shalt.err (!%p509_p2)
}
   0xd   :  { %s513_s9 = scalar_lea.vmem %s34_s24, 192  ;;  %p518_p4 = scmp.lt.s32.totalorder %s34_s24, %s34_s24 }
   0xe   :  { %p514_p3 = scmp.ne.s32.totalorder %s34_s24, %s513_s9  ;;  %p519_p5 = scmp.lt.s32.totalorder %s513_s9, %s513_s9 }
  0x10   :  { %p520_p6 = por %p519_p5, %p518_p4 }
  0x12   :  { %p521_p7 = pnand %p520_p6, %p514_p3 }
  0x14   :  { %524 = shalt.err (!%p521_p7)
}
  0x15   :  { %s599_s10 = smov 64   ;;  %s600_s11 = smov 4  }
  0x16   :  { %39 = dma.hbm_to_vmem [thread:$0]  %s826_s1, 192, %s34_s24, [#allocation7], %s599_s10, %s599_s10, %s600_s11  }
  0x17   :  { %s525_s16 = scalar_lea.hbm %s825_s0, 192 }
  0x18   :  { %p526_p8 = scmp.ne.s32.totalorder %s825_s0, %s525_s16  ;;  %p529_p9 = scmp.lt.u32.totalorder %s525_s16, %s825_s0 }
  0x1a   :  { %p531_p10 = pnand %p529_p9, %p526_p8 }
  0x1c   :  { %534 = shalt.err (!%p531_p10)
}
  0x1d   :  { %s535_s21 = scalar_lea.vmem %s641_s26, 192  ;;  %p540_p12 = scmp.lt.s32.totalorder %s641_s26, %s641_s26 }
  0x1e   :  { %p536_p11 = scmp.ne.s32.totalorder %s641_s26, %s535_s21  ;;  %p541_p13 = scmp.lt.s32.totalorder %s535_s21, %s535_s21 }
  0x20   :  { %p542_p0 = por %p541_p13, %p540_p12 }
  0x22   :  { %p543_p1 = pnand %p542_p0, %p536_p11 }
  0x24   :  { %546 = shalt.err (!%p543_p1)
}
  0x25   :  { %27 = dma.hbm_to_vmem [thread:$0]  %s825_s0, 192, %s641_s26, [#allocation4], %s599_s10, %s599_s10, %s600_s11  }
  0x26   :  { %s601_s23 = smov [#allocation8]   ;;  %s547_s28 = scalar_lea.hbm %s827_s2, 384 }
  0x27   :  { %s46_s24 = sshll.u32 %s601_s23, 4  ;;  %p548_p2 = scmp.ne.s32.totalorder %s827_s2, %s547_s28  ;;  %s47_s24 = int_to_ptr.vmem [resolvable:$true] %s46_s24 }
  0x28   :  { %p551_p3 = scmp.lt.u32.totalorder %s547_s28, %s827_s2 }
  0x2a   :  { %p553_p4 = pnand %p551_p3, %p548_p2 }
  0x2c   :  { %556 = shalt.err (!%p553_p4)
}
  0x2d   :  { %s557_s8 = scalar_lea.vmem %s47_s24, 384  ;;  %p562_p6 = scmp.lt.s32.totalorder %s47_s24, %s47_s24 }
  0x2e   :  { %p558_p5 = scmp.ne.s32.totalorder %s47_s24, %s557_s8  ;;  %p563_p7 = scmp.lt.s32.totalorder %s557_s8, %s557_s8 }
  0x30   :  { %p564_p8 = por %p563_p7, %p562_p6 }
  0x32   :  { %p565_p9 = pnand %p564_p8, %p558_p5 }
  0x34   :  { %568 = shalt.err (!%p565_p9)
}
  0x35   :  { %49 = dma.hbm_to_vmem [thread:$0]  %s827_s2, 384, %s47_s24, [#allocation7]  }
  0x36   :  { %591 = dma.done.wait [#allocation4], 192  }
  0x37   :  { %592 = vsyncadd [#allocation4], 4294967104 }
  0x38   :  { %593 = dma.done.wait [#allocation7], 576  }
  0x39   :  { %594 = vsyncadd [#allocation7], 4294966720  ;;  %vm78_vm0 = vcmask 1041408   ;;  %v87_v31 = vlaneseq  ;;  %v85_v37 = vld [vmem:[#allocation8] ss:$4 sm:$0x3f] }
  0x3a   :  { %v491_v1 = vld.sshfl [vmem:[#allocation3 + $0x4] sm:$0x33 pattern:$0x76325410]  ;;  %vm463_vm1 = vcmask 1024   ;;  %vm472_vm2 = vcmask 0  }
  0x3b   :  { %v170_v2 = vcombine.high %v491_v1, %v491_v1  ;;  %v173_v3 = vsel %vm78_vm0, %v491_v1, 0.0  ;;  %v490_v4 = vld.sshfl [vmem:[#allocation3] sm:$0x33 pattern:$0x76325410]  ;;  %v88_v32 = vshrl.u32 %v87_v31, 7 }
  0x3c   :  { %v75_v5 = vcombine.high %v490_v4, %v490_v4  ;;  %v79_v6 = vsel %vm78_vm0, %v490_v4, 0.0  ;;  %v495_v7 = vld.sshfl [vmem:[#allocation6 + $0x4] sm:$0x33 pattern:$0x76325410] }
  0x3d   :  { %v174_v8 = vsel %vm78_vm0, %v170_v2, 0.0  ;;  %v387_v9 = vcombine.high %v495_v7, %v495_v7  ;;  %v390_v10 = vsel %vm78_vm0, %v495_v7, 0.0  ;;  %v494_v11 = vld.sshfl [vmem:[#allocation6] sm:$0x33 pattern:$0x76325410] }
  0x3e   :  { %v175_v12 = vadd.f32 %v174_v8, %v173_v3  ;;  %v80_v13 = vsel %vm78_vm0, %v75_v5, 0.0  ;;  %v356_v14 = vcombine.high %v494_v11, %v494_v11  ;;  %v359_v15 = vsel %vm78_vm0, %v494_v11, 0.0  ;;  %v496_v16 = vld.sshfl [vmem:[#allocation6 + $0x8] sm:$0x33 pattern:$0x76325410] }
  0x3f   :  { %v81_v17 = vadd.f32 %v80_v13, %v79_v6  ;;  %v391_v18 = vsel %vm78_vm0, %v387_v9, 0.0  ;;  %v418_v19 = vcombine.high %v496_v16, %v496_v16  ;;  %v492_v20 = vld.sshfl [vmem:[#allocation3 + $0x8] sm:$0x33 pattern:$0x76325410]  ;;  %v421_v25 = vsel %vm78_vm0, %v496_v16, 0.0 }
  0x40   :  { %176 = vadd.xlane.f32.xlu1 %v175_v12  ;;  %v392_v21 = vadd.f32 %v391_v18, %v390_v10  ;;  %v360_v22 = vsel %vm78_vm0, %v356_v14, 0.0  ;;  %v234_v23 = vcombine.high %v492_v20, %v492_v20  ;;  %v237_v27 = vsel %vm78_vm0, %v492_v20, 0.0  ;;  %v180_v40 = vld [vmem:[#allocation8 + $0x1] ss:$4 sm:$0x3f] }
  0x41   :  { %82 = vadd.xlane.f32.xlu0 %v81_v17  ;;  %v361_v24 = vadd.f32 %v360_v22, %v359_v15  ;;  %v422_v26 = vsel %vm78_vm0, %v418_v19, 0.0  ;;  %v89_v33 = vsub.s32 0, %v88_v32  ;;  %v93_v34 = vsub.s32 1, %v88_v32  ;;  %v65_v41 = vld [vmem:[%s828_s3] sm:$0x3f] }
  0x42   :  { %v238_v28 = vsel %vm78_vm0, %v234_v23, 0.0  ;;  %v423_v29 = vadd.f32 %v422_v26, %v421_v25  ;;  %v97_v35 = vsub.s32 2, %v88_v32  ;;  %v101_v36 = vsub.s32 3, %v88_v32  ;;  %v244_v50 = vld [vmem:[#allocation8 + $0x2] ss:$4 sm:$0x3f] }
  0x43   :  { %v239_v30 = vadd.f32 %v238_v28, %v237_v27  ;;  %v105_v38 = vsub.s32 4, %v88_v32  ;;  %v109_v39 = vsub.s32 5, %v88_v32  ;;  %v90_v42 = vrot.slane %v85_v37, %v89_v33  ;;  %v288_v59 = vld [vmem:[%s829_s4] sm:$0x3f]  ;;  %s602_s4 = smov [#allocation9]  }
  0x44   :  { %393 = vadd.xlane.f32.xlu1 %v392_v21  ;;  %v94_v43 = vrot.slane %v85_v37, %v93_v34  ;;  %v98_v44 = vrot.slane %v85_v37, %v97_v35  ;;  %v102_v45 = vrot.slane %v85_v37, %v101_v36  ;;  %v185_v48 = vrot.slane %v180_v40, %v89_v33  ;;  %s480_s11 = sshll.u32 %s602_s4, 4  ;;  %s481_s11 = int_to_ptr.vmem [resolvable:$true] %s480_s11 }
  0x45   :  { %362 = vadd.xlane.f32.xlu0 %v361_v24  ;;  %v106_v46 = vrot.slane %v85_v37, %v105_v38  ;;  %v110_v47 = vrot.slane %v85_v37, %v109_v39  ;;  %v189_v49 = vrot.slane %v180_v40, %v93_v34  ;;  %v699_v51 = vrot.slane %v65_v41, %v89_v33  ;;  %s569_s12 = scalar_lea.vmem %s481_s11, 16  ;;  %s573_s13 = scalar_lea.vmem %s481_s11, 32 }
  0x46   :  { %v701_v52 = vrot.slane %v65_v41, %v93_v34  ;;  %v703_v53 = vrot.slane %v65_v41, %v97_v35  ;;  %v705_v54 = vrot.slane %v65_v41, %v101_v36  ;;  %v707_v55 = vrot.slane %v65_v41, %v105_v38  ;;  %p570_p10 = scmp.ne.s32.totalorder %s481_s11, %s569_s12  ;;  %p574_p11 = scmp.lt.s32.totalorder %s481_s11, %s481_s11 }
  0x47   :  { %v709_v56 = vrot.slane %v65_v41, %v109_v39  ;;  %v193_v57 = vrot.slane %v180_v40, %v97_v35  ;;  %v197_v58 = vrot.slane %v180_v40, %v101_v36  ;;  %v201_v61 = vrot.slane %v180_v40, %v105_v38  ;;  %p575_p12 = scmp.lt.s32.totalorder %s573_s13, %s569_s12 }
  0x48   :  { %424 = vadd.xlane.f32.xlu1 %v423_v29  ;;  %v714_v62 = vrot.slane %v180_v40, %v109_v39  ;;  %v716_v63 = vrot.slane %v244_v50, %v89_v33  ;;  %v718_v0 = vrot.slane %v244_v50, %v93_v34  ;;  %v722_v3 = vrot.slane %v244_v50, %v97_v35 }
  0x49   :  { %240 = vadd.xlane.f32.xlu0 %v239_v30  ;;  %v724_v4 = vrot.slane %v244_v50, %v101_v36  ;;  %v726_v5 = vrot.slane %v244_v50, %v105_v38  ;;  %v728_v7 = vrot.slane %v244_v50, %v109_v39  ;;  %v730_v8 = vrot.slane %v288_v59, %v89_v33  ;;  %p576_p13 = por %p575_p12, %p574_p11 }
  0x4a   :  { %v732_v9 = vrot.slane %v288_v59, %v93_v34  ;;  %v734_v10 = vrot.slane %v288_v59, %v97_v35  ;;  %v736_v11 = vrot.slane %v288_v59, %v101_v36  ;;  %v738_v12 = vrot.slane %v288_v59, %v105_v38 }
  0x4b   :  { %v740_v13 = vrot.slane %v288_v59, %v109_v39  ;;  %p577_p0 = pnand %p576_p13, %p570_p10 }
  0xcd   :  { %v177_v60 = vpop.xlane.xlu1 %176 }
  0xce   :  { %v720_v1 = vmul.f32 0.00390625, %v177_v60  ;;  %v83_v2 = vpop.xlane.xlu0 %82 }
  0xcf   :  { %v84_v6 = vmul.f32 0.00390625, %v83_v2 }
  0xd0   :  { %v743_v15 = vmul.f32 %v185_v48, %v720_v1  ;;  %v746_v16 = vmul.f32 %v189_v49, %v720_v1  ;;  %v749_v17 = vmul.f32 %v193_v57, %v720_v1  ;;  %v752_v18 = vmul.f32 %v197_v58, %v720_v1 }
  0xd1   :  { %v394_v14 = vpop.xlane.xlu1 %393  ;;  %v117_v19 = vmul.f32 %v90_v42, %v84_v6  ;;  %v118_v20 = vmul.f32 %v94_v43, %v84_v6  ;;  %v119_v23 = vmul.f32 %v98_v44, %v84_v6  ;;  %v120_v25 = vmul.f32 %v102_v45, %v84_v6 }
  0xd2   :  { %v395_v21 = vmul.f32 0.00390625, %v394_v14  ;;  %v363_v22 = vpop.xlane.xlu0 %362  ;;  %v121_v26 = vmul.f32 %v106_v46, %v84_v6  ;;  %v122_v27 = vmul.f32 %v110_v47, %v84_v6  ;;  %v755_v31 = vmul.f32 %v201_v61, %v720_v1 }
  0xd3   :  { %v364_v24 = vmul.f32 0.00390625, %v363_v22 }
  0xd4   :  { %v396_v28 = vmul.f32 %v395_v21, %v185_v48  ;;  %v397_v29 = vmul.f32 %v395_v21, %v189_v49  ;;  %v398_v30 = vmul.f32 %v395_v21, %v193_v57  ;;  %v399_v40 = vmul.f32 %v395_v21, %v197_v58 }
  0xd5   :  { %v365_v32 = vmul.f32 %v364_v24, %v90_v42  ;;  %v366_v33 = vmul.f32 %v364_v24, %v94_v43  ;;  %v425_v34 = vpop.xlane.xlu1 %424  ;;  %v367_v35 = vmul.f32 %v364_v24, %v98_v44  ;;  %v368_v36 = vmul.f32 %v364_v24, %v102_v45 }
  0xd6   :  { %v426_v37 = vmul.f32 0.00390625, %v425_v34  ;;  %v369_v38 = vmul.f32 %v364_v24, %v106_v46  ;;  %v370_v39 = vmul.f32 %v364_v24, %v110_v47  ;;  %v400_v49 = vmul.f32 %v395_v21, %v201_v61  ;;  %v241_v14 = vpop.xlane.xlu0 %240 }
  0xd7   :  { %v371_v41 = vadd.f32 %v365_v32, %v699_v51  ;;  %v372_v50 = vadd.f32 %v366_v33, %v701_v52  ;;  %v373_v48 = vadd.f32 %v367_v35, %v703_v53  ;;  %v374_v57 = vadd.f32 %v368_v36, %v705_v54 }
  0xd8   :  { %v375_v59 = vadd.f32 %v369_v38, %v707_v55  ;;  %v376_v42 = vadd.f32 %v370_v39, %v709_v56  ;;  %v401_v43 = vmul.f32 %v395_v21, %v714_v62  ;;  %v427_v47 = vmul.f32 %v426_v37, %v716_v63 }
  0xd9   :  { %v402_v44 = vadd.f32 %v396_v28, %v371_v41  ;;  %v403_v45 = vadd.f32 %v397_v29, %v372_v50  ;;  %v404_v46 = vadd.f32 %v398_v30, %v373_v48  ;;  %v405_v58 = vadd.f32 %v399_v40, %v374_v57 }
  0xda   :  { %v406_v60 = vadd.f32 %v400_v49, %v375_v59  ;;  %v407_v2 = vadd.f32 %v401_v43, %v376_v42  ;;  %v428_v6 = vmul.f32 %v426_v37, %v718_v0  ;;  %v429_v61 = vmul.f32 %v426_v37, %v722_v3 }
  0xdb   :  { %v430_v22 = vmul.f32 %v426_v37, %v724_v4  ;;  %v431_v24 = vmul.f32 %v426_v37, %v726_v5  ;;  %v432_v32 = vmul.f32 %v426_v37, %v728_v7  ;;  %v433_v21 = vadd.f32 %v427_v47, %v402_v44 }
  0xdc   :  { %v434_v28 = vadd.f32 %v428_v6, %v403_v45  ;;  %v154_v29 = vadd.f32 %v699_v51, %v117_v19  ;;  %v155_v30 = vadd.f32 %v701_v52, %v118_v20  ;;  %v435_v33 = vadd.f32 %v429_v61, %v404_v46 }
  0xdd   :  { %v436_v34 = vadd.f32 %v430_v22, %v405_v58  ;;  %v437_v35 = vadd.f32 %v431_v24, %v406_v60  ;;  %v438_v36 = vadd.f32 %v432_v32, %v407_v2  ;;  %v242_v38 = vmul.f32 0.00390625, %v241_v14 }
  0xde   :  { %v439_v39 = vmul.f32 %v433_v21, %v730_v8  ;;  %v440_v40 = vmul.f32 %v434_v28, %v732_v9  ;;  %v156_v41 = vadd.f32 %v703_v53, %v119_v23  ;;  %v441_v50 = vmul.f32 %v435_v33, %v734_v10  ;;  %v493_v33 = vld [vmem:[#allocation2] ss:$0 sm:$0xff] }
  0xdf   :  { %v442_v37 = vmul.f32 %v436_v34, %v736_v11  ;;  %v157_v48 = vadd.f32 %v705_v54, %v120_v25  ;;  %v158_v51 = vadd.f32 %v707_v55, %v121_v26  ;;  %v159_v20 = vadd.f32 %v709_v56, %v122_v27 }
  0xe0   :  { %v445_v52 = vsel %vm78_vm0, %v439_v39, 0.0  ;;  %v446_v19 = vsel %vm78_vm0, %v440_v40, 0.0  ;;  %v217_v49 = vmul.f32 %v714_v62, %v720_v1  ;;  %v443_v57 = vmul.f32 %v437_v35, %v738_v12 }
  0xe1   :  { %v444_v53 = vmul.f32 %v438_v36, %v740_v13  ;;  %v447_v23 = vadd.f32 %v446_v19, %v445_v52  ;;  %v218_v59 = vadd.f32 %v743_v15, %v154_v29  ;;  %v448_v54 = vsel %vm78_vm0, %v441_v50, 0.0 }
  0xe2   :  { %v450_v55 = vsel %vm78_vm0, %v442_v37, 0.0  ;;  %v219_v25 = vadd.f32 %v746_v16, %v155_v30  ;;  %v220_v26 = vadd.f32 %v749_v17, %v156_v41  ;;  %v221_v56 = vadd.f32 %v752_v18, %v157_v48 }
  0xe3   :  { %v449_v42 = vadd.f32 %v448_v54, %v447_v23  ;;  %v276_v62 = vmul.f32 %v716_v63, %v242_v38  ;;  %v277_v1 = vmul.f32 %v718_v0, %v242_v38  ;;  %v278_v27 = vmul.f32 %v722_v3, %v242_v38 }
  0xe4   :  { %v279_v43 = vmul.f32 %v724_v4, %v242_v38  ;;  %v280_v15 = vmul.f32 %v726_v5, %v242_v38  ;;  %v281_v44 = vmul.f32 %v728_v7, %v242_v38  ;;  %v222_v16 = vadd.f32 %v755_v31, %v158_v51 }
  0xe5   :  { %v451_v45 = vadd.f32 %v450_v55, %v449_v42  ;;  %v282_v46 = vadd.f32 %v276_v62, %v218_v59  ;;  %v283_v17 = vadd.f32 %v277_v1, %v219_v25  ;;  %v452_v47 = vsel %vm78_vm0, %v443_v57, 0.0 }
  0xe6   :  { %v223_v18 = vadd.f32 %v217_v49, %v159_v20  ;;  %v284_v58 = vadd.f32 %v278_v27, %v220_v26  ;;  %v285_v63 = vadd.f32 %v279_v43, %v221_v56  ;;  %v286_v0 = vadd.f32 %v280_v15, %v222_v16 }
  0xe7   :  { %v453_v60 = vadd.f32 %v452_v47, %v451_v45  ;;  %v320_v3 = vmul.f32 %v730_v8, %v282_v46  ;;  %v321_v4 = vmul.f32 %v732_v9, %v283_v17  ;;  %v454_v5 = vsel %vm78_vm0, %v444_v53, 0.0 }
  0xe8   :  { %v287_v2 = vadd.f32 %v281_v44, %v223_v18  ;;  %v322_v7 = vmul.f32 %v734_v10, %v284_v58  ;;  %v323_v31 = vmul.f32 %v736_v11, %v285_v63  ;;  %v324_v24 = vmul.f32 %v738_v12, %v286_v0 }
  0xe9   :  { %v455_v6 = vadd.f32 %v454_v5, %v453_v60  ;;  %v326_v14 = vsel %vm78_vm0, %v320_v3, 0.0  ;;  %v327_v61 = vsel %vm78_vm0, %v321_v4, 0.0 }
  0xea   :  { %v328_v22 = vadd.f32 %v327_v61, %v326_v14  ;;  %v329_v8 = vsel %vm78_vm0, %v322_v7, 0.0  ;;  %v325_v9 = vmul.f32 %v740_v13, %v287_v2  ;;  %v331_v21 = vsel %vm78_vm0, %v323_v31, 0.0 }
  0xeb   :  { %456 = vadd.xlane.f32.xlu1 %v455_v6  ;;  %v333_v10 = vsel %vm78_vm0, %v324_v24, 0.0 }
  0xec   :  { %v330_v32 = vadd.f32 %v329_v8, %v328_v22  ;;  %v335_v11 = vsel %vm78_vm0, %v325_v9, 0.0 }
  0xee   :  { %v332_v28 = vadd.f32 %v331_v21, %v330_v32 }
  0xf0   :  { %v334_v29 = vadd.f32 %v333_v10, %v332_v28 }
  0xf2   :  { %v336_v30 = vadd.f32 %v335_v11, %v334_v29 }
  0xf4   :  { %337 = vadd.xlane.f32.xlu0 %v336_v30 }
 0x178   :  { %v457_v34 = vpop.xlane.xlu1 %456 }
 0x179   :  { %v458_v35 = vadd.f32 %v493_v33, %v457_v34 }
 0x181   :  { %v338_v36 = vpop.xlane.xlu0 %337 }
 0x182   :  { %v346_v12 = vadd.f32 %v493_v33, %v338_v36 }
 0x184   :  { %v459_v38 = vsub.f32 %v346_v12, %v458_v35 }
 0x186   :  { %v460_v39 = vsub.f32 1.0, %v459_v38 }
 0x188   :  { %v461_v40 = vmax.f32 %v460_v39, 0.0 }
 0x18a   :  { %v462_v13 = vmul.f32 0.5, %v461_v40 }
 0x18c   :  { %v464_v41 = vsel %vm463_vm1, %v462_v13, 0.0 }
 0x18d   :  { %v465_v50 = vrot.slane %v464_v41, 4 }
 0x18f   :  { %v466_v37 = vadd.f32 %v465_v50, %v464_v41 }
 0x191   :  { %v467_v48 = vrot.slane %v466_v37, 2 }
 0x193   :  { %v468_v51 = vadd.f32 %v467_v48, %v466_v37 }
 0x195   :  { %v469_v52 = vrot.slane %v468_v51, 1 }
 0x197   :  { %v470_v19 = vadd.f32 %v469_v52, %v468_v51 }
 0x199   :  { %v471_v20 = vmul.f32 0.5, %v470_v19 }
 0x19b   :  { %473 = vst.msk [vmem:[#allocation9] sm:$0x1] %vm472_vm2, %v471_v20 }
 0x19c   :  { %580 = shalt.err (!%p577_p0)
}
 0x19d   :  { %s581_s16 = scalar_lea.hbm %s831_s6, 16 }
 0x19e   :  { %p582_p1 = scmp.ne.s32.totalorder %s831_s6, %s581_s16  ;;  %p585_p2 = scmp.lt.u32.totalorder %s581_s16, %s831_s6 }
 0x1a0   :  { %p587_p3 = pnand %p585_p2, %p582_p1 }
 0x1a2   :  { %590 = shalt.err (!%p587_p3)
}
 0x1a3   :  { %483 = dma.vmem_to_hbm [thread:$0]  %s481_s11, 16, %s831_s6, [#allocation5]  }
 0x1a4   :  { %595 = dma.done.wait [#allocation5], 16  }
 0x1a5   :  { %596 = vsyncadd [#allocation5], 4294967280 }
 0x1a6   :  { %487 = vsyncpa [#allocation4], 1 }
 0x1a7   :  { %488 = vsyncpa [#allocation7], 1 }
 0x1a8   :  { %489 = vsyncpa [#allocation5], 1 }

</bundles_post_ra>
